<compile_context>
chip_gen: v6e
topology: v6e:2x2x1
jax: 0.10.0
libtpu: 0.0.40
codegen_flags: <defaults>
</compile_context>

<pallas_src>
import jax
import jax.numpy as jnp
from jax import lax
from jax.experimental import pallas as pl
from jax.experimental.pallas import tpu as pltpu

BN_EPS = 1e-3        # PyTorch BatchNorm1d(momentum=0.01, eps=0.001) in build_multi_layers
NEG_PAD = -1e30      # padded head columns: softmax / exp contribute exactly 0


def _round_up(x, m):
    return ((x + m - 1) // m) * m


def _full_vmem_spec(shape):
    nd = len(shape)
    # grid-less call: index_map takes no grid args and returns block 0.
    return pl.BlockSpec(shape, lambda *_, _nd=nd: (0,) * _nd)


def _vmem_limit_bytes():
    # Generation-aware: ~80% of physical VMEM, capped at 100 MiB.
    # v7x (64 MiB) -> ~51 MiB; v5e/v6e (128 MiB) -> 100 MiB.
    try:
        cap = pltpu.get_tpu_info().vmem_capacity_bytes
    except Exception:
        cap = 128 * 1024 * 1024
    return min(int(cap * 0.8), 100 * 1024 * 1024)


def _pick_batch_tile(B, hidden1, genes_pad, vmem_limit):
    """Largest batch tile for the head kernel that fits the VMEM budget."""
    budget = int(vmem_limit * 0.6)
    resident = hidden1 * 2 * genes_pad * 2 + 2 * genes_pad * 4  # bf16 w_head + f32 b_head
    for tb in (1024, 512, 256, 128, 64, 32, 16, 8):
        if tb > B or B % tb != 0:
            continue
        per_tile = (2 * (tb * hidden1 * 2 + tb * 4)      # double-buffered d + exp_sf tiles
                    + 2 * 3 * tb * genes_pad * 4         # double-buffered output tiles
                    + tb * 2 * genes_pad * 4             # logits
                    + 2 * tb * genes_pad * 4)            # softmax temporaries
        if resident + per_tile <= budget:
            return tb
    return B


# ---------------------------------------------------------------------------
# Stage-1 kernel: encoder + decoder-MLP (Linear -> BN(train stats) -> ReLU)*
# Full batch in one invocation (BN batch statistics must span the whole batch).
# ---------------------------------------------------------------------------
def _linear_bn_relu(x_bf16, w_bf16, packed):
    b = packed[0:1, :]
    g = packed[1:2, :]
    beta = packed[2:3, :]
    y = jnp.dot(x_bf16, w_bf16, preferred_element_type=jnp.float32) + b  # MXU, f32 acc
    mean = jnp.mean(y, axis=0, keepdims=True)                            # biased batch stats
    diff = y - mean
    var = jnp.mean(diff * diff, axis=0, keepdims=True)
    s = g * lax.rsqrt(var + BN_EPS)          # per-feature scale (EUP rsqrt)
    z = y * s + (beta - mean * s)            # folded BN affine: 2 per-element ops
    return jnp.maximum(z, 0.0)               # ReLU, f32


def make_mlp_kernel(n_enc, n_dec):
    n_in = 1 + 2 * (n_enc + n_dec)

    def kernel(*refs):
        in_refs = refs[:n_in]
        latent_ref, d_ref = refs[n_in:]
        idx = 0
        h = in_refs[idx][...]                # X, bf16
        idx += 1
        for li in range(n_enc + n_dec):
            w = in_refs[idx][...]            # bf16 weight
            p = in_refs[idx + 1][...]        # packed (3, n_out): bias / gamma / beta
            idx += 2
            h = _linear_bn_relu(h.astype(jnp.bfloat16), w, p)
            if li == n_enc - 1:
                latent_ref[...] = h          # latent_z in f32
        d_ref[...] = h.astype(jnp.bfloat16)  # decoder-MLP output, fed to bf16 head matmul

    return kernel


# ---------------------------------------------------------------------------
# Stage-2 kernel: NB head, batch-tiled "parallel" grid.
# Stacked (scale | r) matmul -> 128-aligned split -> softmax / exp / recon.
# ---------------------------------------------------------------------------
def make_head_kernel(genes_pad):
    def kernel(d_ref, w_ref, b_ref, sf_ref, norm_ref, disp_ref, recon_ref):
        logits = jnp.dot(d_ref[...], w_ref[...],
                         preferred_element_type=jnp.float32) + b_ref[...]
        s_logits = logits[:, :genes_pad]     # 128-aligned split -> free view
        r_logits = logits[:, genes_pad:]
        m = jnp.max(s_logits, axis=1, keepdims=True)
        e = jnp.exp(s_logits - m)
        den = jnp.sum(e, axis=1, keepdims=True)
        norm = e * (1.0 / den)               # exact reciprocal for torch-softmax parity
        norm_ref[...] = norm
        disp_ref[...] = jnp.exp(r_logits)
        recon_ref[...] = sf_ref[...] * norm  # exp(scale_factor) hoisted to the wrapper

    return kernel


# ---------------------------------------------------------------------------
# Parameter construction (deterministic, PyTorch-default-style init)
# ---------------------------------------------------------------------------
def init_linear(key, fan_in, fan_out):
    kw, kb = jax.random.split(key)
    bound = 1.0 / jnp.sqrt(jnp.float32(fan_in))
    w = jax.random.uniform(kw, (fan_in, fan_out), jnp.float32, -bound, bound)
    b = jax.random.uniform(kb, (1, fan_out), jnp.float32, -bound, bound)
    return w, b


def init_ae_params(key, layer_e, layer_d, hidden1):
    genes = layer_e[0]
    genes_pad = _round_up(genes, 128)
    params = {"layers": [], "n_enc": len(layer_e) - 1, "n_dec": len(layer_d) - 1,
              "genes": genes, "genes_pad": genes_pad,
              "latent_dim": layer_e[-1], "hidden1": hidden1}

    def bn_pack(b, n_out):
        gamma = jnp.ones((1, n_out), jnp.float32)
        beta = jnp.zeros((1, n_out), jnp.float32)
        return jnp.concatenate([b, gamma, beta], axis=0)     # (3, n_out): one DMA

    for (n_in, n_out) in zip(layer_e[:-1], layer_e[1:]):
        key, sub = jax.random.split(key)
        w, b = init_linear(sub, n_in, n_out)
        params["layers"].append((w.astype(jnp.bfloat16), bn_pack(b, n_out)))
    for (n_in, n_out) in zip(layer_d[:-1], layer_d[1:]):
        key, sub = jax.random.split(key)
        w, b = init_linear(sub, n_in, n_out)
        params["layers"].append((w.astype(jnp.bfloat16), bn_pack(b, n_out)))

    key, k1, k2 = jax.random.split(key, 3)
    ws, bs = init_linear(k1, hidden1, genes)   # decoder_scale
    wr, br = init_linear(k2, hidden1, genes)   # decoder_r
    pad = genes_pad - genes
    ws_p = jnp.pad(ws, ((0, 0), (0, pad)))
    wr_p = jnp.pad(wr, ((0, 0), (0, pad)))
    bs_p = jnp.pad(bs, ((0, 0), (0, pad)), constant_values=NEG_PAD)
    br_p = jnp.pad(br, ((0, 0), (0, pad)), constant_values=NEG_PAD)
    params["w_head"] = jnp.concatenate([ws_p, wr_p], axis=1).astype(jnp.bfloat16)
    params["b_head"] = jnp.concatenate([bs_p, br_p], axis=1)   # f32, -1e30 in padded cols
    return params


# ---------------------------------------------------------------------------
# AE.forward == AE.inference (type='NB')
# ---------------------------------------------------------------------------
def ae_forward(params, X, scale_factor):
    n_enc, n_dec = params["n_enc"], params["n_dec"]
    genes, genes_pad = params["genes"], params["genes_pad"]
    latent_dim, hidden1 = params["latent_dim"], params["hidden1"]
    B = X.shape[0]
    vmem_limit = _vmem_limit_bytes()

    # --- stage 1: encoder + decoder-MLP (full batch => exact BN batch stats) ---
    inputs = [X.astype(jnp.bfloat16)]
    for (w, p) in params["layers"]:
        inputs.extend((w, p))
    mlp_out_shape = (jax.ShapeDtypeStruct((B, latent_dim), jnp.float32),
                     jax.ShapeDtypeStruct((B, hidden1), jnp.bfloat16))
    latent_z, d = pl.pallas_call(
        make_mlp_kernel(n_enc, n_dec),
        out_shape=mlp_out_shape,
        in_specs=[_full_vmem_spec(a.shape) for a in inputs],
        out_specs=tuple(_full_vmem_spec(s.shape) for s in mlp_out_shape),
        compiler_params=pltpu.CompilerParams(vmem_limit_bytes=vmem_limit),
    )(*inputs)

    # --- stage 2: NB head, batch-tiled parallel grid (big (B, genes) tensors) ---
    exp_sf = jnp.exp(scale_factor.astype(jnp.float32))   # tiny (B,1) op, hoisted
    w_head, b_head = params["w_head"], params["b_head"]
    tb = _pick_batch_tile(B, hidden1, genes_pad, vmem_limit)
    grid = (B // tb,)
    head_out_shape = tuple(jax.ShapeDtypeStruct((B, genes_pad), jnp.float32)
                           for _ in range(3))
    norm_p, disp_p, recon_p = pl.pallas_call(
        make_head_kernel(genes_pad),
        grid=grid,
        out_shape=head_out_shape,
        in_specs=[pl.BlockSpec((tb, hidden1), lambda i: (i, 0)),          # d tile
                  pl.BlockSpec((hidden1, 2 * genes_pad), lambda i: (0, 0)),  # w_head (resident)
                  pl.BlockSpec((1, 2 * genes_pad), lambda i: (0, 0)),        # b_head
                  pl.BlockSpec((tb, 1), lambda i: (i, 0))],                  # exp(scale_factor)
        out_specs=tuple(pl.BlockSpec((tb, genes_pad), lambda i: (i, 0))
                        for _ in range(3)),
        compiler_params=pltpu.CompilerParams(
            dimension_semantics=("parallel",),
            vmem_limit_bytes=vmem_limit),
    )(d, w_head, b_head, exp_sf)

    if genes_pad != genes:
        norm_x = norm_p[:, :genes]
        disper_x = disp_p[:, :genes]
        recon_x = recon_p[:, :genes]
    else:
        norm_x, disper_x, recon_x = norm_p, disp_p, recon_p
    return dict(norm_x=norm_x, disper_x=disper_x, recon_x=recon_x, latent_z=latent_z)


if __name__ == "__main__":
    # Small shapes consistent with the module: input genes = layer_e[0],
    # latent = layer_e[-1], decoder MLP layer_d, hidden1 = layer_d[-1].
    B = 8
    layer_e = [64, 32, 16]
    layer_d = [16, 32]
    hidden1 = 32

    root = jax.random.PRNGKey(0)
    k_param, k_x, k_sf = jax.random.split(root, 3)

    params = init_ae_params(k_param, layer_e, layer_d, hidden1)
    # X: normalized expression-like input (non-negative); scale_factor: log size factors.
    X = jax.nn.relu(jax.random.normal(k_x, (B, layer_e[0]), jnp.float32))
    scale_factor = 0.1 * jax.random.normal(k_sf, (B, 1), jnp.float32)

    out = ae_forward(params, X, scale_factor)
    out = jax.block_until_ready(out)

    assert out["latent_z"].shape == (B, layer_e[-1])
    assert out["norm_x"].shape == (B, layer_e[0])
    assert out["disper_x"].shape == (B, layer_e[0])
    assert out["recon_x"].shape == (B, layer_e[0])
    assert bool(jnp.all(jnp.isfinite(out["recon_x"])))
    row_sums = jnp.sum(out["norm_x"], axis=1)
    assert bool(jnp.all(jnp.abs(row_sums - 1.0) < 1e-3))   # softmax rows sum to 1
    print("KERNEL_OK")
</pallas_src>

<mosaic_0001>
module attributes {stable_mosaic.version = 11 : i64} {
  func.func @kernel(%arg0: memref<8x64xbf16, #tpu.memory_space<vmem>>, %arg1: memref<64x32xbf16, #tpu.memory_space<vmem>>, %arg2: memref<3x32xf32, #tpu.memory_space<vmem>>, %arg3: memref<32x16xbf16, #tpu.memory_space<vmem>>, %arg4: memref<3x16xf32, #tpu.memory_space<vmem>>, %arg5: memref<16x32xbf16, #tpu.memory_space<vmem>>, %arg6: memref<3x32xf32, #tpu.memory_space<vmem>>, %arg7: memref<8x16xf32, #tpu.memory_space<vmem>>, %arg8: memref<8x32xbf16, #tpu.memory_space<vmem>>) attributes {dimension_semantics = [], scalar_prefetch = 0 : i64, scratch_operands = 0 : i64, tpu.core_type = #tpu.core_type<tc>} {
    %c0 = arith.constant 0 : index
    %c0_0 = arith.constant 0 : index
    %0 = vector.load %arg0[%c0, %c0_0] : memref<8x64xbf16, #tpu.memory_space<vmem>>, vector<8x64xbf16>
    %c0_1 = arith.constant 0 : index
    %c0_2 = arith.constant 0 : index
    %1 = vector.load %arg1[%c0_1, %c0_2] : memref<64x32xbf16, #tpu.memory_space<vmem>>, vector<64x32xbf16>
    %c0_3 = arith.constant 0 : index
    %c0_4 = arith.constant 0 : index
    %2 = vector.load %arg2[%c0_3, %c0_4] : memref<3x32xf32, #tpu.memory_space<vmem>>, vector<3x32xf32>
    %3 = vector.extract_strided_slice %2 {offsets = [0, 0], sizes = [1, 32], strides = [1, 1]} : vector<3x32xf32> to vector<1x32xf32>
    %4 = vector.extract_strided_slice %2 {offsets = [1, 0], sizes = [1, 32], strides = [1, 1]} : vector<3x32xf32> to vector<1x32xf32>
    %5 = vector.extract_strided_slice %2 {offsets = [2, 0], sizes = [1, 32], strides = [1, 1]} : vector<3x32xf32> to vector<1x32xf32>
    %cst = arith.constant dense<0.000000e+00> : vector<8x32xf32>
    %6 = tpu.matmul %0, %1, %cst {dimension_numbers = #tpu.dot_dimension_numbers<[1], [0], [0], [1], [0, 0, 1, 1], [], []>} : vector<8x64xbf16>, vector<64x32xbf16>, vector<8x32xf32> -> vector<8x32xf32>
    %7 = vector.broadcast %3 : vector<1x32xf32> to vector<8x32xf32>
    %8 = arith.addf %6, %7 : vector<8x32xf32>
    %cst_5 = arith.constant dense<0.000000e+00> : vector<32xf32>
    %9 = vector.multi_reduction <add>, %8, %cst_5 [0] : vector<8x32xf32> to vector<32xf32>
    %10 = vector.shape_cast %9 : vector<32xf32> to vector<1x32xf32>
    %cst_6 = arith.constant 8.000000e+00 : f32
    %11 = vector.broadcast %cst_6 : f32 to vector<1x32xf32>
    %12 = arith.divf %10, %11 : vector<1x32xf32>
    %13 = vector.broadcast %12 : vector<1x32xf32> to vector<8x32xf32>
    %14 = arith.subf %8, %13 : vector<8x32xf32>
    %15 = arith.mulf %14, %14 : vector<8x32xf32>
    %cst_7 = arith.constant dense<0.000000e+00> : vector<32xf32>
    %16 = vector.multi_reduction <add>, %15, %cst_7 [0] : vector<8x32xf32> to vector<32xf32>
    %17 = vector.shape_cast %16 : vector<32xf32> to vector<1x32xf32>
    %cst_8 = arith.constant 8.000000e+00 : f32
    %18 = vector.broadcast %cst_8 : f32 to vector<1x32xf32>
    %19 = arith.divf %17, %18 : vector<1x32xf32>
    %cst_9 = arith.constant 1.000000e-03 : f32
    %20 = vector.broadcast %cst_9 : f32 to vector<1x32xf32>
    %21 = arith.addf %19, %20 : vector<1x32xf32>
    %22 = math.rsqrt %21 : vector<1x32xf32>
    %23 = arith.mulf %4, %22 : vector<1x32xf32>
    %24 = vector.broadcast %23 : vector<1x32xf32> to vector<8x32xf32>
    %25 = arith.mulf %8, %24 : vector<8x32xf32>
    %26 = arith.mulf %12, %23 : vector<1x32xf32>
    %27 = arith.subf %5, %26 : vector<1x32xf32>
    %28 = vector.broadcast %27 : vector<1x32xf32> to vector<8x32xf32>
    %29 = arith.addf %25, %28 : vector<8x32xf32>
    %cst_10 = arith.constant 0.000000e+00 : f32
    %30 = vector.broadcast %cst_10 : f32 to vector<8x32xf32>
    %31 = arith.maximumf %29, %30 : vector<8x32xf32>
    %c0_11 = arith.constant 0 : index
    %c0_12 = arith.constant 0 : index
    %32 = vector.load %arg3[%c0_11, %c0_12] : memref<32x16xbf16, #tpu.memory_space<vmem>>, vector<32x16xbf16>
    %c0_13 = arith.constant 0 : index
    %c0_14 = arith.constant 0 : index
    %33 = vector.load %arg4[%c0_13, %c0_14] : memref<3x16xf32, #tpu.memory_space<vmem>>, vector<3x16xf32>
    %34 = arith.truncf %31 : vector<8x32xf32> to vector<8x32xbf16>
    %35 = vector.extract_strided_slice %33 {offsets = [0, 0], sizes = [1, 16], strides = [1, 1]} : vector<3x16xf32> to vector<1x16xf32>
    %36 = vector.extract_strided_slice %33 {offsets = [1, 0], sizes = [1, 16], strides = [1, 1]} : vector<3x16xf32> to vector<1x16xf32>
    %37 = vector.extract_strided_slice %33 {offsets = [2, 0], sizes = [1, 16], strides = [1, 1]} : vector<3x16xf32> to vector<1x16xf32>
    %cst_15 = arith.constant dense<0.000000e+00> : vector<8x16xf32>
    %38 = tpu.matmul %34, %32, %cst_15 {dimension_numbers = #tpu.dot_dimension_numbers<[1], [0], [0], [1], [0, 0, 1, 1], [], []>} : vector<8x32xbf16>, vector<32x16xbf16>, vector<8x16xf32> -> vector<8x16xf32>
    %39 = vector.broadcast %35 : vector<1x16xf32> to vector<8x16xf32>
    %40 = arith.addf %38, %39 : vector<8x16xf32>
    %cst_16 = arith.constant dense<0.000000e+00> : vector<16xf32>
    %41 = vector.multi_reduction <add>, %40, %cst_16 [0] : vector<8x16xf32> to vector<16xf32>
    %42 = vector.shape_cast %41 : vector<16xf32> to vector<1x16xf32>
    %cst_17 = arith.constant 8.000000e+00 : f32
    %43 = vector.broadcast %cst_17 : f32 to vector<1x16xf32>
    %44 = arith.divf %42, %43 : vector<1x16xf32>
    %45 = vector.broadcast %44 : vector<1x16xf32> to vector<8x16xf32>
    %46 = arith.subf %40, %45 : vector<8x16xf32>
    %47 = arith.mulf %46, %46 : vector<8x16xf32>
    %cst_18 = arith.constant dense<0.000000e+00> : vector<16xf32>
    %48 = vector.multi_reduction <add>, %47, %cst_18 [0] : vector<8x16xf32> to vector<16xf32>
    %49 = vector.shape_cast %48 : vector<16xf32> to vector<1x16xf32>
    %cst_19 = arith.constant 8.000000e+00 : f32
    %50 = vector.broadcast %cst_19 : f32 to vector<1x16xf32>
    %51 = arith.divf %49, %50 : vector<1x16xf32>
    %cst_20 = arith.constant 1.000000e-03 : f32
    %52 = vector.broadcast %cst_20 : f32 to vector<1x16xf32>
    %53 = arith.addf %51, %52 : vector<1x16xf32>
    %54 = math.rsqrt %53 : vector<1x16xf32>
    %55 = arith.mulf %36, %54 : vector<1x16xf32>
    %56 = vector.broadcast %55 : vector<1x16xf32> to vector<8x16xf32>
    %57 = arith.mulf %40, %56 : vector<8x16xf32>
    %58 = arith.mulf %44, %55 : vector<1x16xf32>
    %59 = arith.subf %37, %58 : vector<1x16xf32>
    %60 = vector.broadcast %59 : vector<1x16xf32> to vector<8x16xf32>
    %61 = arith.addf %57, %60 : vector<8x16xf32>
    %cst_21 = arith.constant 0.000000e+00 : f32
    %62 = vector.broadcast %cst_21 : f32 to vector<8x16xf32>
    %63 = arith.maximumf %61, %62 : vector<8x16xf32>
    %c0_22 = arith.constant 0 : index
    %c0_23 = arith.constant 0 : index
    %64 = vector.load %arg7[%c0_22, %c0_23] : memref<8x16xf32, #tpu.memory_space<vmem>>, vector<8x16xf32>
    tpu.vector_store %arg7[%c0_22, %c0_23], %63 {strides = array<i32>} : memref<8x16xf32, #tpu.memory_space<vmem>>, vector<8x16xf32>,
    %c0_24 = arith.constant 0 : index
    %c0_25 = arith.constant 0 : index
    %65 = vector.load %arg5[%c0_24, %c0_25] : memref<16x32xbf16, #tpu.memory_space<vmem>>, vector<16x32xbf16>
    %c0_26 = arith.constant 0 : index
    %c0_27 = arith.constant 0 : index
    %66 = vector.load %arg6[%c0_26, %c0_27] : memref<3x32xf32, #tpu.memory_space<vmem>>, vector<3x32xf32>
    %67 = arith.truncf %63 : vector<8x16xf32> to vector<8x16xbf16>
    %68 = vector.extract_strided_slice %66 {offsets = [0, 0], sizes = [1, 32], strides = [1, 1]} : vector<3x32xf32> to vector<1x32xf32>
    %69 = vector.extract_strided_slice %66 {offsets = [1, 0], sizes = [1, 32], strides = [1, 1]} : vector<3x32xf32> to vector<1x32xf32>
    %70 = vector.extract_strided_slice %66 {offsets = [2, 0], sizes = [1, 32], strides = [1, 1]} : vector<3x32xf32> to vector<1x32xf32>
    %cst_28 = arith.constant dense<0.000000e+00> : vector<8x32xf32>
    %71 = tpu.matmul %67, %65, %cst_28 {dimension_numbers = #tpu.dot_dimension_numbers<[1], [0], [0], [1], [0, 0, 1, 1], [], []>} : vector<8x16xbf16>, vector<16x32xbf16>, vector<8x32xf32> -> vector<8x32xf32>
    %72 = vector.broadcast %68 : vector<1x32xf32> to vector<8x32xf32>
    %73 = arith.addf %71, %72 : vector<8x32xf32>
    %cst_29 = arith.constant dense<0.000000e+00> : vector<32xf32>
    %74 = vector.multi_reduction <add>, %73, %cst_29 [0] : vector<8x32xf32> to vector<32xf32>
    %75 = vector.shape_cast %74 : vector<32xf32> to vector<1x32xf32>
    %cst_30 = arith.constant 8.000000e+00 : f32
    %76 = vector.broadcast %cst_30 : f32 to vector<1x32xf32>
    %77 = arith.divf %75, %76 : vector<1x32xf32>
    %78 = vector.broadcast %77 : vector<1x32xf32> to vector<8x32xf32>
    %79 = arith.subf %73, %78 : vector<8x32xf32>
    %80 = arith.mulf %79, %79 : vector<8x32xf32>
    %cst_31 = arith.constant dense<0.000000e+00> : vector<32xf32>
    %81 = vector.multi_reduction <add>, %80, %cst_31 [0] : vector<8x32xf32> to vector<32xf32>
    %82 = vector.shape_cast %81 : vector<32xf32> to vector<1x32xf32>
    %cst_32 = arith.constant 8.000000e+00 : f32
    %83 = vector.broadcast %cst_32 : f32 to vector<1x32xf32>
    %84 = arith.divf %82, %83 : vector<1x32xf32>
    %cst_33 = arith.constant 1.000000e-03 : f32
    %85 = vector.broadcast %cst_33 : f32 to vector<1x32xf32>
    %86 = arith.addf %84, %85 : vector<1x32xf32>
    %87 = math.rsqrt %86 : vector<1x32xf32>
    %88 = arith.mulf %69, %87 : vector<1x32xf32>
    %89 = vector.broadcast %88 : vector<1x32xf32> to vector<8x32xf32>
    %90 = arith.mulf %73, %89 : vector<8x32xf32>
    %91 = arith.mulf %77, %88 : vector<1x32xf32>
    %92 = arith.subf %70, %91 : vector<1x32xf32>
    %93 = vector.broadcast %92 : vector<1x32xf32> to vector<8x32xf32>
    %94 = arith.addf %90, %93 : vector<8x32xf32>
    %cst_34 = arith.constant 0.000000e+00 : f32
    %95 = vector.broadcast %cst_34 : f32 to vector<8x32xf32>
    %96 = arith.maximumf %94, %95 : vector<8x32xf32>
    %97 = arith.truncf %96 : vector<8x32xf32> to vector<8x32xbf16>
    %c0_35 = arith.constant 0 : index
    %c0_36 = arith.constant 0 : index
    %98 = vector.load %arg8[%c0_35, %c0_36] : memref<8x32xbf16, #tpu.memory_space<vmem>>, vector<8x32xbf16>
    tpu.vector_store %arg8[%c0_35, %c0_36], %97 {strides = array<i32>} : memref<8x32xbf16, #tpu.memory_space<vmem>>, vector<8x32xbf16>,
    return
  }
}

</mosaic_0001>

<bundles_post_ra>
// kernel: tpu_custom_call.1
= control target key start
LH: loop header
LB: loop body
LE: loop exit
PB: predicated region body
PF: predicated region fallthrough
CT: control target
= control target key end

     0   :  { %14 = vsyncpa [#allocation3], 0  ;;  %v488_v1 = vmov 0.0   ;;  %vm489_vm0 = vmmov 0   ;;  %s613_s0 = inlined_call_operand.vmem [shape: bf16[8,64], index: 0, kind: input, shape index: {}]   ;;  %s614_s1 = inlined_call_operand.vmem [shape: bf16[64,32], index: 1, kind: input, shape index: {}]   ;;  %s615_s2 = inlined_call_operand.vmem [shape: f32[3,32], index: 2, kind: input, shape index: {}]   ;;  %s616_s3 = inlined_call_operand.vmem [shape: bf16[32,16], index: 3, kind: input, shape index: {}]   ;;  %s617_s4 = inlined_call_operand.vmem [shape: f32[3,16], index: 4, kind: input, shape index: {}]   ;;  %s618_s5 = inlined_call_operand.vmem [shape: bf16[16,32], index: 5, kind: input, shape index: {}]   ;;  %s619_s6 = inlined_call_operand.vmem [shape: f32[3,32], index: 6, kind: input, shape index: {}]   ;;  %s620_s7 = inlined_call_operand.hbm [shape: f32[8,16], index: 7, kind: output, shape index: {0}]   ;;  %s621_s8 = inlined_call_operand.hbm [shape: bf16[8,32], index: 8, kind: output, shape index: {1}]  }
   0x1   :  { %v431_v0 = vld [vmem:[%s614_s1 + $0x18] sm:$0xff]   ;;  %401 = vmatprep.subr.bf16.mxu0 %v488_v1  ;;  %413 = vmatprep.subr.bf16.mxu1 %v488_v1  ;;  %v432_v2 = vld [vmem:[%s614_s1 + $0x10] sm:$0xff]   ;;  %v433_v3 = vld [vmem:[%s614_s1 + $0x8] sm:$0xff]  }
   0x2   :  { %402 = vmatpush3.bf16.msra.mxu0 %v431_v0  ;;  %409 = vmatprep.mubr.msk.bf16.mxu0 %vm489_vm0, %v488_v1 }
   0x3   :  { %403 = vmatprep.subr.bf16.mxu0 %v488_v1  ;;  %417 = vmatprep.mubr.msk.bf16.mxu1 %vm489_vm0, %v488_v1 }
   0x6   :  { %404 = vmatpush3.bf16.msra.mxu0 %v432_v2 }
   0x7   :  { %405 = vmatprep.subr.bf16.mxu0 %v488_v1 }
   0x8   :  { %15 = vsyncpa [#allocation5], 0  ;;  %v434_v4 = vld [vmem:[%s614_s1] sm:$0xff]   ;;  %vm69_vm1 = vcmask 523264   ;;  %v435_v6 = vld [vmem:[%s616_s3 + $0x8] sm:$0xff]   ;;  %v41_v8 = vlaneseq  ;;  %vm113_vm2 = vcmask 261120  }
   0x9   :  { %v31_v5 = vld [vmem:[%s613_s0] sm:$0xf]  ;;  %414 = vmatpush3.bf16.msra.mxu1 %v435_v6  ;;  %vm217_vm3 = vcmask 130048  }
   0xa   :  { %406 = vmatpush3.bf16.msra.mxu0 %v433_v3  ;;  %415 = vmatprep.subr.bf16.mxu1 %v488_v1  ;;  %v436_v7 = vld [vmem:[%s616_s3] sm:$0xff]   ;;  %v42_v9 = vshrl.u32 %v41_v8, 7 }
   0xb   :  { %407 = vmatprep.subr.bf16.mxu0 %v488_v1  ;;  %v40_v11 = vld [vmem:[%s615_s2] sm:$0x7] }
   0xc   :  { %v569_v10 = vsub.s32 0, %v42_v9  ;;  %v577_v39 = vsub.s32 1, %v42_v9  ;;  %v580_v43 = vsub.s32 2, %v42_v9  ;;  %v437_v50 = vld [vmem:[%s618_s5] sm:$0xff]  }
   0xd   :  { %416 = vmatpush3.bf16.msra.mxu1 %v436_v7  ;;  %v156_v51 = vld [vmem:[%s617_s4] sm:$0x7]  ;;  %s490_s4 = smov [#allocation2]  }
   0xe   :  { %408 = vmatpush3.bf16.msra.mxu0 %v434_v4  ;;  %421 = vmatprep.subr.bf16.mxu1 %v488_v1  ;;  %v44_v12 = vrot.slane %v40_v11, %v569_v10  ;;  %v161_v52 = vrot.slane %v156_v51, %v569_v10  ;;  %s359_s5 = sshll.u32 %s490_s4, 4  ;;  %s360_s5 = int_to_ptr.vmem [resolvable:$true] %s359_s5 }
   0xf   :  { %s444_s21 = scalar_lea.vmem %s360_s5, 128  ;;  %p449_p1 = scmp.lt.s32.totalorder %s360_s5, %s360_s5 }
  0x10   :  { %p445_p0 = scmp.ne.s32.totalorder %s360_s5, %s444_s21  ;;  %p450_p2 = scmp.lt.s32.totalorder %s444_s21, %s444_s21 }
  0x11   :  { %410 = vmatmul.mubr.msk.bf16.vlgmr.msra.gmra.mxu0 %vm69_vm1, %v31_v5 }
  0x12   :  { %p451_p3 = por %p450_p2, %p449_p1 }
  0x14   :  { %p452_p4 = pnand %p451_p3, %p445_p0 }
  0xd1   :  { %v107_v13 = vpop.f32.mrf.mxu0 }
  0xd2   :  { %v108_v14 = vadd.f32 %v107_v13, %v44_v12 }
  0xd3   :  { %v411_v15 = vpop.f32.mrf.mxu0 }
  0xd4   :  { %v114_v16 = vsel %vm113_vm2, %v108_v14, 0.0 }
  0xd5   :  { %v115_v17 = vrot.slane %v114_v16, 4  ;;  %v110_v18 = vpop.f32.mrf.mxu0 }
  0xd7   :  { %v116_v19 = vadd.f32 %v115_v17, %v114_v16  ;;  %v412_v20 = vpop.f32.mrf.mxu0 }
  0xd9   :  { %v117_v21 = vrot.slane %v116_v19, 2 }
  0xdb   :  { %v118_v22 = vadd.f32 %v117_v21, %v116_v19 }
  0xdd   :  { %v119_v23 = vrot.slane %v118_v22, 1 }
  0xdf   :  { %v120_v24 = vadd.f32 %v119_v23, %v118_v22 }
  0xe1   :  { %v122_v25 = vmul.f32 0.125, %v120_v24 }
  0xe3   :  { %v123_v26 = vsub.f32 %v108_v14, %v122_v25 }
  0xe5   :  { %v124_v27 = vmul.f32 %v123_v26, %v123_v26 }
  0xe7   :  { %v125_v28 = vsel %vm113_vm2, %v124_v27, 0.0 }
  0xe8   :  { %v126_v29 = vrot.slane %v125_v28, 4 }
  0xea   :  { %v127_v30 = vadd.f32 %v126_v29, %v125_v28 }
  0xec   :  { %v128_v31 = vrot.slane %v127_v30, 2 }
  0xee   :  { %v129_v32 = vadd.f32 %v128_v31, %v127_v30 }
  0xf0   :  { %v130_v33 = vrot.slane %v129_v32, 1 }
  0xf2   :  { %v131_v34 = vadd.f32 %v130_v33, %v129_v32 }
  0xf4   :  { %v132_v35 = vmul.f32 0.125, %v131_v34 }
  0xf6   :  { %v133_v36 = vadd.f32 0.001, %v132_v35 }
  0xf8   :  { %438 = vrsqrt.f32 %v133_v36 }
 0x105   :  { %v439_v37 = vpop.eup %438 }
 0x106   :  { %v135_v38 = vmul.f32 %v439_v37, %v40_v11 }
 0x108   :  { %v141_v40 = vmul.f32 %v135_v38, %v122_v25  ;;  %v139_v41 = vrot.slane %v135_v38, %v577_v39 }
 0x10a   :  { %v143_v42 = vrot.slane %v141_v40, 7  ;;  %v140_v45 = vmul.f32 %v139_v41, %v108_v14 }
 0x10c   :  { %v145_v44 = vsub.f32 %v40_v11, %v143_v42 }
 0x10e   :  { %v149_v46 = vrot.slane %v145_v44, %v580_v43 }
 0x110   :  { %v150_v47 = vadd.f32 %v149_v46, %v140_v45 }
 0x112   :  { %v151_v48 = vmax.f32 %v150_v47, 0.0 }
 0x114   :  { %v157_v49 = vpack.c.bf16 %v151_v48, %v151_v48 }
 0x116   :  { %418 = vmatmul.mubr.msk.bf16.vlgmr.msra.gmra.mxu1 %vm113_vm2, %v157_v49 }
 0x117   :  { %423 = vmatprep.mubr.msk.bf16.mxu1 %vm489_vm0, %v488_v1  ;;  %422 = vmatpush3.bf16.msra.mxu1 %v437_v50 }
 0x1d6   :  { %v211_v53 = vpop.f32.mrf.mxu1 }
 0x1d7   :  { %v212_v54 = vadd.f32 %v211_v53, %v161_v52 }
 0x1d8   :  { %v419_v55 = vpop.f32.mrf.mxu1 }
 0x1d9   :  { %v218_v56 = vsel %vm217_vm3, %v212_v54, 0.0 }
 0x1da   :  { %v219_v57 = vrot.slane %v218_v56, 4  ;;  %v214_v58 = vpop.f32.mrf.mxu1 }
 0x1dc   :  { %v220_v59 = vadd.f32 %v219_v57, %v218_v56  ;;  %v420_v60 = vpop.f32.mrf.mxu1 }
 0x1de   :  { %v221_v61 = vrot.slane %v220_v59, 2 }
 0x1e0   :  { %v222_v62 = vadd.f32 %v221_v61, %v220_v59 }
 0x1e2   :  { %v223_v63 = vrot.slane %v222_v62, 1 }
 0x1e4   :  { %v224_v0 = vadd.f32 %v223_v63, %v222_v62 }
 0x1e6   :  { %v225_v1 = vmul.f32 0.125, %v224_v0 }
 0x1e8   :  { %v226_v2 = vsub.f32 %v212_v54, %v225_v1 }
 0x1ea   :  { %v227_v3 = vmul.f32 %v226_v2, %v226_v2 }
 0x1ec   :  { %v228_v4 = vsel %vm217_vm3, %v227_v3, 0.0 }
 0x1ed   :  { %v229_v5 = vrot.slane %v228_v4, 4 }
 0x1ef   :  { %v230_v6 = vadd.f32 %v229_v5, %v228_v4 }
 0x1f1   :  { %v231_v7 = vrot.slane %v230_v6, 2 }
 0x1f3   :  { %v232_v8 = vadd.f32 %v231_v7, %v230_v6 }
 0x1f5   :  { %v233_v9 = vrot.slane %v232_v8, 1 }
 0x1f7   :  { %v234_v11 = vadd.f32 %v233_v9, %v232_v8 }
 0x1f9   :  { %v235_v12 = vmul.f32 0.125, %v234_v11 }
 0x1fb   :  { %v236_v13 = vadd.f32 0.001, %v235_v12 }
 0x1fd   :  { %440 = vrsqrt.f32 %v236_v13 }
 0x20a   :  { %v441_v14 = vpop.eup %440 }
 0x20b   :  { %v238_v15 = vmul.f32 %v441_v14, %v156_v51 }
 0x20d   :  { %v244_v16 = vmul.f32 %v238_v15, %v225_v1  ;;  %v242_v17 = vrot.slane %v238_v15, %v577_v39 }
 0x20f   :  { %v246_v18 = vrot.slane %v244_v16, 7  ;;  %v243_v20 = vmul.f32 %v242_v17, %v212_v54 }
 0x211   :  { %v248_v19 = vsub.f32 %v156_v51, %v246_v18 }
 0x213   :  { %v252_v21 = vrot.slane %v248_v19, %v580_v43 }
 0x215   :  { %v253_v22 = vadd.f32 %v252_v21, %v243_v20 }
 0x217   :  { %v254_v23 = vmax.f32 %v253_v22, 0.0 }
 0x219   :  { %v259_v24 = vpack.c.bf16 %v254_v23, %v254_v23  ;;  %255 = vst.msk [vmem:[#allocation2] sm:$0xff] %vm217_vm3, %v254_v23 }
 0x21b   :  { %424 = vmatmul.mubr.msk.bf16.vlgmr.msra.gmra.mxu1 %vm217_vm3, %v259_v24 }
 0x21c   :  { %455 = shalt.err (!%p452_p4)
}
 0x21d   :  { %362 = dma.vmem_to_hbm [thread:$0]  %s360_s5, 128, %s620_s7, [#allocation3]   ;;  %v258_v25 = vld [vmem:[%s619_s6] sm:$0x7]  ;;  %vm351_vm4 = vcmask 257024  }
 0x21e   :  { %v263_v26 = vrot.slane %v258_v25, %v569_v10  ;;  %s491_s6 = smov [#allocation4]  }
 0x21f   :  { %s369_s7 = sshll.u32 %s491_s6, 4  ;;  %s370_s7 = int_to_ptr.vmem [resolvable:$true] %s369_s7 }
 0x220   :  { %s464_s26 = scalar_lea.vmem %s370_s7, 64  ;;  %p469_p6 = scmp.lt.s32.totalorder %s370_s7, %s370_s7 }
 0x221   :  { %p465_p5 = scmp.ne.s32.totalorder %s370_s7, %s464_s26  ;;  %p470_p7 = scmp.lt.s32.totalorder %s464_s26, %s464_s26 }
 0x223   :  { %p471_p8 = por %p470_p7, %p469_p6 }
 0x225   :  { %p472_p9 = pnand %p471_p8, %p465_p5 }
 0x2db   :  { %v307_v27 = vpop.f32.mrf.mxu1 }
 0x2dc   :  { %v308_v28 = vadd.f32 %v307_v27, %v263_v26 }
 0x2dd   :  { %v425_v29 = vpop.f32.mrf.mxu1 }
 0x2de   :  { %v313_v30 = vsel %vm113_vm2, %v308_v28, 0.0 }
 0x2df   :  { %v314_v31 = vrot.slane %v313_v30, 4  ;;  %v310_v32 = vpop.f32.mrf.mxu1 }
 0x2e1   :  { %v315_v33 = vadd.f32 %v314_v31, %v313_v30  ;;  %v426_v34 = vpop.f32.mrf.mxu1 }
 0x2e3   :  { %v316_v35 = vrot.slane %v315_v33, 2 }
 0x2e5   :  { %v317_v36 = vadd.f32 %v316_v35, %v315_v33 }
 0x2e7   :  { %v318_v37 = vrot.slane %v317_v36, 1 }
 0x2e9   :  { %v319_v38 = vadd.f32 %v318_v37, %v317_v36 }
 0x2eb   :  { %v320_v40 = vmul.f32 0.125, %v319_v38 }
 0x2ed   :  { %v321_v41 = vsub.f32 %v308_v28, %v320_v40 }
 0x2ef   :  { %v322_v42 = vmul.f32 %v321_v41, %v321_v41 }
 0x2f1   :  { %v323_v44 = vsel %vm113_vm2, %v322_v42, 0.0 }
 0x2f2   :  { %v324_v45 = vrot.slane %v323_v44, 4 }
 0x2f4   :  { %v325_v10 = vadd.f32 %v324_v45, %v323_v44 }
 0x2f6   :  { %v326_v46 = vrot.slane %v325_v10, 2 }
 0x2f8   :  { %v327_v47 = vadd.f32 %v326_v46, %v325_v10 }
 0x2fa   :  { %v328_v48 = vrot.slane %v327_v47, 1 }
 0x2fc   :  { %v329_v49 = vadd.f32 %v328_v48, %v327_v47 }
 0x2fe   :  { %v330_v50 = vmul.f32 0.125, %v329_v49 }
 0x300   :  { %v331_v51 = vadd.f32 0.001, %v330_v50 }
 0x302   :  { %442 = vrsqrt.f32 %v331_v51 }
 0x30f   :  { %v443_v52 = vpop.eup %442 }
 0x310   :  { %v333_v53 = vmul.f32 %v443_v52, %v258_v25 }
 0x312   :  { %v339_v54 = vmul.f32 %v333_v53, %v320_v40  ;;  %v337_v55 = vrot.slane %v333_v53, %v577_v39 }
 0x314   :  { %v341_v56 = vrot.slane %v339_v54, 7  ;;  %v338_v58 = vmul.f32 %v337_v55, %v308_v28 }
 0x316   :  { %v343_v57 = vsub.f32 %v258_v25, %v341_v56 }
 0x318   :  { %v347_v59 = vrot.slane %v343_v57, %v580_v43 }
 0x31a   :  { %v348_v60 = vadd.f32 %v347_v59, %v338_v58 }
 0x31c   :  { %v349_v61 = vmax.f32 %v348_v60, 0.0 }
 0x31e   :  { %v350_v62 = vpack.c.bf16 %v349_v61, %v349_v61 }
 0x320   :  { %352 = vst.msk [vmem:[#allocation4] sm:$0xf] %vm351_vm4, %v350_v62 }
 0x321   :  { %475 = shalt.err (!%p472_p9)
}
 0x322   :  { %372 = dma.vmem_to_hbm [thread:$0]  %s370_s7, 64, %s621_s8, [#allocation5]  }
 0x323   :  { %484 = dma.done.wait [#allocation3], 128  }
 0x324   :  { %485 = vsyncadd [#allocation3], 4294967168 }
 0x325   :  { %486 = dma.done.wait [#allocation5], 64  }
 0x326   :  { %487 = vsyncadd [#allocation5], 4294967232 }
 0x327   :  { %379 = vsyncpa [#allocation3], 1 }
 0x328   :  { %380 = vsyncpa [#allocation5], 1 }

</bundles_post_ra>
